<compile_context>
chip_gen: v7x
topology: tpu7x:2x2x1
jax: 0.10.0
libtpu: 0.0.40
codegen_flags: <defaults>
</compile_context>

<pallas_src>
import functools
import math

import jax
import jax.numpy as jnp
from jax.experimental import pallas as pl
from jax.experimental.pallas import tpu as pltpu


def _round_up(x, m):
    return (x + m - 1) // m * m


def _c1d_kernel(xcol_ref, w_ref, gamma_ref, beta_ref, o_ref, *,
                B, tC, eps, slope, inv_n):
    """One channel tile: fused im2col matmul + BatchNorm (batch stats) + LeakyReLU.

    xcol_ref:  (1, B*tC, K*D)  im2col tile, row = b*tC + cc, col = k*D + d (pipelined)
    w_ref:     (K*D, F)        conv weight, row index = k*D + d (resident)
    gamma_ref: (Cwork, 1)      BN scale over the padded channel axis (resident)
    beta_ref:  (Cwork, 1)      BN shift (resident)
    o_ref:     (B, tC, F)      output tile, already in the module's (B, C, F) layout
    """
    c0 = pl.program_id(0) * tC
    if tC % 8 == 0:
        c0 = pl.multiple_of(c0, 8)          # sublane-aligned dynamic slice start

    # Conv1d for the whole tile as ONE MXU push: all B batches and all K taps are
    # already merged into the contraction / row axes by the wrapper-side im2col.
    y = jnp.dot(xcol_ref[0], w_ref[...],
                preferred_element_type=jnp.float32)          # (B*tC, F), f32

    # Per-batch row blocks are aligned static views (tC % 8 == 0 in the tiled path).
    y_blocks = [y[b * tC:(b + 1) * tC, :] for b in range(B)]

    # BatchNorm1d(num_features=C) training-mode batch statistics, per channel row:
    # reduce over the F lanes (XLU slot) and the B batch blocks. Centered two-pass
    # variance (matches the reference; avoids E[x^2] - mean^2 cancellation).
    s = jnp.zeros((tC, 1), jnp.float32)
    for yb in y_blocks:
        s = s + jnp.sum(yb, axis=1, keepdims=True)
    mean = s * inv_n                                          # (tC, 1)

    ss = jnp.zeros((tC, 1), jnp.float32)
    yc_blocks = []
    for yb in y_blocks:
        yc = yb - mean
        yc_blocks.append(yc)
        ss = ss + jnp.sum(yc * yc, axis=1, keepdims=True)
    var = ss * inv_n                                          # biased variance

    gamma = gamma_ref[pl.ds(c0, tC), :]                       # (tC, 1), resident slice
    beta = beta_ref[pl.ds(c0, tC), :]
    scale = gamma * jax.lax.rsqrt(var + eps)
    # TODO(synk): running_mean / running_var buffer updates (training-time BN state)
    # are not emitted by this forward kernel.

    # Normalize + LeakyReLU(0.2); store each batch block directly in (B, C, F)
    # layout so there is no reshape/transpose dispatch after the pallas_call.
    for b in range(B):
        yn = yc_blocks[b] * scale + beta
        o_ref[b] = jnp.where(yn >= 0, yn, slope * yn).astype(o_ref.dtype)


def c1d_forward(x, conv_weight, gamma, beta, *, kernel, eps=1e-5, slope=0.2,
                use_bf16_matmul=False):
    """
    x:           (B, C, D) float32 -- (batch, input_channels, input_dims)
    conv_weight: (F, D, K) float32 -- torch Conv1d weight layout (out, in, k), no bias
    gamma, beta: (C,)      float32 -- BatchNorm1d affine parameters
    returns:     (B, C, F) float32
    """
    B, C, D = x.shape
    F_, D_w, K = conv_weight.shape
    assert D_w == D and K == kernel
    pad = math.ceil((kernel - 1) / 2)
    KD = K * D
    lane = 128

    # ---- per-generation VMEM sizing (v5e/v6e: 128 MiB, v7x: 64 MiB per TC) ----
    try:
        vmem_phys = int(getattr(pltpu.get_tpu_info(), "vmem_capacity_bytes",
                                64 * 1024 * 1024))
    except Exception:                       # conservative fallback = v7x per-TC figure
        vmem_phys = 64 * 1024 * 1024
    vmem_limit = max(32 << 20, min(vmem_phys * 3 // 4, 96 << 20))

    c8 = _round_up(C, 8)
    in_bytes = 2 if use_bf16_matmul else 4
    # Resident (constant index_map) arrays, double-buffered by Pallas: weight + gamma/beta.
    resident = 2 * (_round_up(KD, 8) * lane * in_bytes + 2 * c8 * lane * 4)
    # Per-channel-row VMEM of one grid step: double-buffered im2col block,
    # double-buffered output block, plus the live f32 matmul result (lane-padded).
    per_c = B * (2 * _round_up(KD, lane) * in_bytes
                 + 2 * _round_up(F_, lane) * 4
                 + _round_up(F_, lane) * 4)
    budget = max(8 * per_c, min(vmem_limit, 64 << 20) // 2 - resident)

    # ---- channel tile: sublane-aligned, VMEM-bounded; >= 2 tiles when C is large
    #      so the "parallel" grid axis can shard across both v7x TensorCores ----
    if C % 8 == 0:
        tC = min(C, max(8, (budget // per_c) // 8 * 8))
        if C >= 256:
            tC = min(tC, max(8, _round_up(pl.cdiv(C, 2), 8)))
    else:
        tC = C                   # full-axis block (block dim == array dim is legal)
    nC = pl.cdiv(C, tC)
    Cwork = nC * tC              # padded channel extent covered by the grid (>= C)
    # NOTE: when C % tC != 0, channels >= C are computed from zero padding and are
    # discarded by Pallas' masked partial-block writeback; BN stats are per-channel
    # so real channels are never contaminated.

    # ---- wrapper-side im2col (pure layout plumbing; input is K*D per output row) ----
    x_f = x.astype(jnp.float32)
    xp = jnp.pad(x_f, ((0, 0), (pad, Cwork + (K - 1) - pad - C), (0, 0)))
    # xcol[b, c, k*D + d] = xpad[b, c + k, d]
    xcol = jnp.concatenate([xp[:, k:k + Cwork, :] for k in range(K)], axis=-1)
    # Flatten per channel tile: (B, Cwork, KD) -> (nC, B*tC, KD), row = b*tC + cc,
    # so the kernel gets a ready-to-matmul 2-D block with no in-kernel reshapes.
    xcol = (xcol.reshape(B, nC, tC, KD)
                .transpose(1, 0, 2, 3)
                .reshape(nC, B * tC, KD))

    # torch Conv1d weight (F, D, K) -> (K*D, F), contraction row index = k*D + d.
    w2 = jnp.transpose(conv_weight, (2, 1, 0)).reshape(KD, F_).astype(jnp.float32)
    if use_bf16_matmul:
        xcol = xcol.astype(jnp.bfloat16)
        w2 = w2.astype(jnp.bfloat16)

    g2 = jnp.pad(gamma.astype(jnp.float32), (0, Cwork - C)).reshape(Cwork, 1)
    b2 = jnp.pad(beta.astype(jnp.float32), (0, Cwork - C)).reshape(Cwork, 1)

    kern = functools.partial(_c1d_kernel, B=B, tC=tC, eps=float(eps),
                             slope=float(slope), inv_n=1.0 / float(B * F_))
    return pl.pallas_call(
        kern,
        out_shape=jax.ShapeDtypeStruct((B, C, F_), jnp.float32),
        grid_spec=pltpu.PrefetchScalarGridSpec(
            num_scalar_prefetch=0,
            grid=(nC,),
            in_specs=[
                pl.BlockSpec((1, B * tC, KD), lambda i: (i, 0, 0)),  # pipelined im2col
                pl.BlockSpec(w2.shape, lambda i: (0, 0)),            # resident weight
                pl.BlockSpec(g2.shape, lambda i: (0, 0)),            # resident gamma
                pl.BlockSpec(b2.shape, lambda i: (0, 0)),            # resident beta
            ],
            out_specs=pl.BlockSpec((B, tC, F_), lambda i: (0, i, 0)),
        ),
        compiler_params=pltpu.CompilerParams(
            dimension_semantics=("parallel",),   # C tiles are fully independent
            vmem_limit_bytes=int(vmem_limit),
        ),
    )(xcol, w2, g2, b2)


def _reference(x, conv_weight, gamma, beta, kernel, eps=1e-5, slope=0.2):
    """Plain-JAX reference of the same forward semantics (training-mode BN)."""
    B, C, D = x.shape
    F_ = conv_weight.shape[0]
    pad = math.ceil((kernel - 1) / 2)
    xp = jnp.pad(x, ((0, 0), (pad, pad), (0, 0)))
    y = jnp.zeros((B, C, F_), dtype=jnp.float32)
    for k in range(kernel):
        y = y + jnp.einsum("bcd,fd->bcf", xp[:, k:k + C, :], conv_weight[:, :, k])
    mean = y.mean(axis=(0, 2), keepdims=True)
    var = ((y - mean) ** 2).mean(axis=(0, 2), keepdims=True)
    y = (y - mean) / jnp.sqrt(var + eps)
    y = y * gamma.reshape(1, C, 1) + beta.reshape(1, C, 1)
    return jnp.where(y >= 0, y, slope * y)


if __name__ == "__main__":
    # Module-consistent small shapes:
    #   input_channels (C) = 16, input_dims (D) = 8, filters (F) = 16, kernel = 3
    B, C, D, F_, K = 2, 16, 8, 16, 3

    key = jax.random.PRNGKey(0)
    kx, kw, kx2, kg, kb = jax.random.split(key, 5)
    x = jax.random.normal(kx, (B, C, D), dtype=jnp.float32)

    # Deterministic conv weight init (kaiming-uniform-like bound, no bias).
    fan_in = D * K
    bound = 1.0 / math.sqrt(fan_in)
    conv_weight = jax.random.uniform(kw, (F_, D, K), dtype=jnp.float32,
                                     minval=-bound, maxval=bound)
    # BatchNorm1d default affine init: gamma = 1, beta = 0.
    gamma = jnp.ones((C,), dtype=jnp.float32)
    beta = jnp.zeros((C,), dtype=jnp.float32)

    out = c1d_forward(x, conv_weight, gamma, beta, kernel=K)
    out = jax.block_until_ready(out)
    ref = _reference(x, conv_weight, gamma, beta, K)
    assert out.shape == (B, C, F_)
    assert jnp.allclose(out, ref, atol=1e-4, rtol=1e-4), "mismatch vs reference (small)"

    # Also exercise the multi-tile path (nC >= 2 -> megacore-parallel grid axis).
    C2 = 256
    x2 = jax.random.normal(kx2, (B, C2, D), dtype=jnp.float32)
    gamma2 = jax.random.uniform(kg, (C2,), dtype=jnp.float32, minval=0.5, maxval=1.5)
    beta2 = 0.1 * jax.random.normal(kb, (C2,), dtype=jnp.float32)
    out2 = jax.block_until_ready(c1d_forward(x2, conv_weight, gamma2, beta2, kernel=K))
    ref2 = _reference(x2, conv_weight, gamma2, beta2, K)
    assert out2.shape == (B, C2, F_)
    assert jnp.allclose(out2, ref2, atol=1e-4, rtol=1e-4), "mismatch vs reference (tiled)"

    print("KERNEL_OK")
</pallas_src>

<mosaic_0001>
module attributes {stable_mosaic.version = 11 : i64} {
  func.func @_c1d_kernel(%arg0: i32, %arg1: memref<1x32x24xf32, #tpu.memory_space<vmem>>, %arg2: memref<24x16xf32, #tpu.memory_space<vmem>>, %arg3: memref<16x1xf32, #tpu.memory_space<vmem>>, %arg4: memref<16x1xf32, #tpu.memory_space<vmem>>, %arg5: memref<2x16x16xf32, #tpu.memory_space<vmem>>) attributes {dimension_semantics = [#tpu.dimension_semantics<parallel>], iteration_bounds = array<i64: 1>, scalar_prefetch = 0 : i64, scratch_operands = 0 : i64, tpu.core_type = #tpu.core_type<tc>, window_params = [{transform_indices = @transform_0, window_bounds = array<i64: 1, 32, 24>}, {pipeline_mode = #tpu.pipeline_mode<synchronous>, transform_indices = @transform_1, window_bounds = array<i64: 24, 16>}, {pipeline_mode = #tpu.pipeline_mode<synchronous>, transform_indices = @transform_2, window_bounds = array<i64: 16, 1>}, {pipeline_mode = #tpu.pipeline_mode<synchronous>, transform_indices = @transform_3, window_bounds = array<i64: 16, 1>}, {transform_indices = @transform_4, window_bounds = array<i64: 2, 16, 16>}]} {
    %c16_i32 = arith.constant 16 : i32
    %0 = arith.muli %arg0, %c16_i32 : i32
    %1 = tpu.assume_multiple %0, 8 : i32
    %c0 = arith.constant 0 : index
    %c0_0 = arith.constant 0 : index
    %c0_1 = arith.constant 0 : index
    %2 = vector.load %arg1[%c0, %c0_0, %c0_1] : memref<1x32x24xf32, #tpu.memory_space<vmem>>, vector<1x32x24xf32>
    %3 = vector.shape_cast %2 : vector<1x32x24xf32> to vector<32x24xf32>
    %c0_2 = arith.constant 0 : index
    %c0_3 = arith.constant 0 : index
    %4 = vector.load %arg2[%c0_2, %c0_3] : memref<24x16xf32, #tpu.memory_space<vmem>>, vector<24x16xf32>
    %cst = arith.constant dense<0.000000e+00> : vector<32x16xf32>
    %5 = tpu.matmul %3, %4, %cst {dimension_numbers = #tpu.dot_dimension_numbers<[1], [0], [0], [1], [0, 0, 1, 1], [], []>} : vector<32x24xf32>, vector<24x16xf32>, vector<32x16xf32> -> vector<32x16xf32>
    %6 = vector.extract_strided_slice %5 {offsets = [0, 0], sizes = [16, 16], strides = [1, 1]} : vector<32x16xf32> to vector<16x16xf32>
    %7 = vector.extract_strided_slice %5 {offsets = [16, 0], sizes = [16, 16], strides = [1, 1]} : vector<32x16xf32> to vector<16x16xf32>
    %cst_4 = arith.constant 0.000000e+00 : f32
    %8 = vector.broadcast %cst_4 : f32 to vector<16x1xf32>
    %cst_5 = arith.constant dense<0.000000e+00> : vector<16xf32>
    %9 = vector.multi_reduction <add>, %6, %cst_5 [1] : vector<16x16xf32> to vector<16xf32>
    %10 = vector.shape_cast %9 : vector<16xf32> to vector<16x1xf32>
    %11 = arith.addf %8, %10 : vector<16x1xf32>
    %cst_6 = arith.constant dense<0.000000e+00> : vector<16xf32>
    %12 = vector.multi_reduction <add>, %7, %cst_6 [1] : vector<16x16xf32> to vector<16xf32>
    %13 = vector.shape_cast %12 : vector<16xf32> to vector<16x1xf32>
    %14 = arith.addf %11, %13 : vector<16x1xf32>
    %cst_7 = arith.constant 3.125000e-02 : f32
    %15 = vector.broadcast %cst_7 : f32 to vector<16x1xf32>
    %16 = arith.mulf %14, %15 : vector<16x1xf32>
    %cst_8 = arith.constant 0.000000e+00 : f32
    %17 = vector.broadcast %cst_8 : f32 to vector<16x1xf32>
    %18 = vector.broadcast %16 : vector<16x1xf32> to vector<16x16xf32>
    %19 = arith.subf %6, %18 : vector<16x16xf32>
    %20 = arith.mulf %19, %19 : vector<16x16xf32>
    %cst_9 = arith.constant dense<0.000000e+00> : vector<16xf32>
    %21 = vector.multi_reduction <add>, %20, %cst_9 [1] : vector<16x16xf32> to vector<16xf32>
    %22 = vector.shape_cast %21 : vector<16xf32> to vector<16x1xf32>
    %23 = arith.addf %17, %22 : vector<16x1xf32>
    %24 = vector.broadcast %16 : vector<16x1xf32> to vector<16x16xf32>
    %25 = arith.subf %7, %24 : vector<16x16xf32>
    %26 = arith.mulf %25, %25 : vector<16x16xf32>
    %cst_10 = arith.constant dense<0.000000e+00> : vector<16xf32>
    %27 = vector.multi_reduction <add>, %26, %cst_10 [1] : vector<16x16xf32> to vector<16xf32>
    %28 = vector.shape_cast %27 : vector<16xf32> to vector<16x1xf32>
    %29 = arith.addf %23, %28 : vector<16x1xf32>
    %cst_11 = arith.constant 3.125000e-02 : f32
    %30 = vector.broadcast %cst_11 : f32 to vector<16x1xf32>
    %31 = arith.mulf %29, %30 : vector<16x1xf32>
    %32 = arith.index_cast %1 : i32 to index
    %c0_12 = arith.constant 0 : index
    %33 = vector.load %arg3[%32, %c0_12] : memref<16x1xf32, #tpu.memory_space<vmem>>, vector<16x1xf32>
    %34 = arith.index_cast %1 : i32 to index
    %c0_13 = arith.constant 0 : index
    %35 = vector.load %arg4[%34, %c0_13] : memref<16x1xf32, #tpu.memory_space<vmem>>, vector<16x1xf32>
    %cst_14 = arith.constant 9.99999974E-6 : f32
    %36 = vector.broadcast %cst_14 : f32 to vector<16x1xf32>
    %37 = arith.addf %31, %36 : vector<16x1xf32>
    %38 = math.rsqrt %37 : vector<16x1xf32>
    %39 = arith.mulf %33, %38 : vector<16x1xf32>
    %40 = vector.broadcast %39 : vector<16x1xf32> to vector<16x16xf32>
    %41 = arith.mulf %19, %40 : vector<16x16xf32>
    %42 = vector.broadcast %35 : vector<16x1xf32> to vector<16x16xf32>
    %43 = arith.addf %41, %42 : vector<16x16xf32>
    %cst_15 = arith.constant 0.000000e+00 : f32
    %44 = vector.broadcast %cst_15 : f32 to vector<16x16xf32>
    %45 = arith.cmpf oge, %43, %44 : vector<16x16xf32>
    %cst_16 = arith.constant 2.000000e-01 : f32
    %46 = vector.broadcast %cst_16 : f32 to vector<16x16xf32>
    %47 = arith.mulf %46, %43 : vector<16x16xf32>
    %48 = arith.select %45, %43, %47 : vector<16x16xi1>, vector<16x16xf32>
    %c0_17 = arith.constant 0 : index
    %c0_18 = arith.constant 0 : index
    %c0_19 = arith.constant 0 : index
    %49 = vector.load %arg5[%c0_17, %c0_18, %c0_19] : memref<2x16x16xf32, #tpu.memory_space<vmem>>, vector<1x16x16xf32>
    %50 = vector.shape_cast %49 : vector<1x16x16xf32> to vector<16x16xf32>
    %51 = vector.shape_cast %48 : vector<16x16xf32> to vector<1x16x16xf32>
    tpu.vector_store %arg5[%c0_17, %c0_18, %c0_19], %51 {strides = array<i32>} : memref<2x16x16xf32, #tpu.memory_space<vmem>>, vector<1x16x16xf32>,
    %52 = vector.broadcast %39 : vector<16x1xf32> to vector<16x16xf32>
    %53 = arith.mulf %25, %52 : vector<16x16xf32>
    %54 = vector.broadcast %35 : vector<16x1xf32> to vector<16x16xf32>
    %55 = arith.addf %53, %54 : vector<16x16xf32>
    %cst_20 = arith.constant 0.000000e+00 : f32
    %56 = vector.broadcast %cst_20 : f32 to vector<16x16xf32>
    %57 = arith.cmpf oge, %55, %56 : vector<16x16xf32>
    %cst_21 = arith.constant 2.000000e-01 : f32
    %58 = vector.broadcast %cst_21 : f32 to vector<16x16xf32>
    %59 = arith.mulf %58, %55 : vector<16x16xf32>
    %60 = arith.select %57, %55, %59 : vector<16x16xi1>, vector<16x16xf32>
    %c1 = arith.constant 1 : index
    %c0_22 = arith.constant 0 : index
    %c0_23 = arith.constant 0 : index
    %61 = vector.load %arg5[%c1, %c0_22, %c0_23] : memref<2x16x16xf32, #tpu.memory_space<vmem>>, vector<1x16x16xf32>
    %62 = vector.shape_cast %61 : vector<1x16x16xf32> to vector<16x16xf32>
    %63 = vector.shape_cast %60 : vector<16x16xf32> to vector<1x16x16xf32>
    tpu.vector_store %arg5[%c1, %c0_22, %c0_23], %63 {strides = array<i32>} : memref<2x16x16xf32, #tpu.memory_space<vmem>>, vector<1x16x16xf32>,
    return
  }
  func.func @transform_0(%arg0: i32) -> (i32, i32, i32) {
    %c0_i32 = arith.constant 0 : i32
    %c0_i32_0 = arith.constant 0 : i32
    %c0_i32_1 = arith.constant 0 : i32
    return %arg0, %c0_i32, %c0_i32_0 : i32, i32, i32
  }
  func.func @transform_1(%arg0: i32) -> (i32, i32) {
    %c0_i32 = arith.constant 0 : i32
    %c0_i32_0 = arith.constant 0 : i32
    %c0_i32_1 = arith.constant 0 : i32
    return %c0_i32, %c0_i32_0 : i32, i32
  }
  func.func @transform_2(%arg0: i32) -> (i32, i32) {
    %c0_i32 = arith.constant 0 : i32
    %c0_i32_0 = arith.constant 0 : i32
    %c0_i32_1 = arith.constant 0 : i32
    return %c0_i32, %c0_i32_0 : i32, i32
  }
  func.func @transform_3(%arg0: i32) -> (i32, i32) {
    %c0_i32 = arith.constant 0 : i32
    %c0_i32_0 = arith.constant 0 : i32
    %c0_i32_1 = arith.constant 0 : i32
    return %c0_i32, %c0_i32_0 : i32, i32
  }
  func.func @transform_4(%arg0: i32) -> (i32, i32, i32) {
    %c0_i32 = arith.constant 0 : i32
    %c0_i32_0 = arith.constant 0 : i32
    %c0_i32_1 = arith.constant 0 : i32
    return %c0_i32, %arg0, %c0_i32_0 : i32, i32, i32
  }
}

</mosaic_0001>

<bundles_post_ra>
// kernel: tpu_custom_call.1
= control target key start
LH: loop header
LB: loop body
LE: loop exit
PB: predicated region body
PF: predicated region fallthrough
CT: control target
= control target key end

     0   :  { %vm26_vm0 = vcmask 195584   ;;  %s397_s0 = inlined_call_operand.vmem [shape: f32[1,32,24], index: 0, kind: input, shape index: {}]   ;;  %s398_s1 = inlined_call_operand.vmem [shape: f32[24,16], index: 1, kind: input, shape index: {}]   ;;  %s399_s2 = inlined_call_operand.vmem [shape: f32[16,1], index: 2, kind: input, shape index: {}]   ;;  %s400_s3 = inlined_call_operand.vmem [shape: f32[16,1], index: 3, kind: input, shape index: {}]   ;;  %s401_s4 = inlined_call_operand.hbm [shape: f32[2,16,16], index: 4, kind: output, shape index: {}]  }
   0x1   :  { %v23_v0 = vld [vmem:[%s398_s1] sm:$0xff]  ;;  %v24_v1 = vld [vmem:[%s398_s1 + $0x8] sm:$0xff]  ;;  %v21_v4 = vld [vmem:[%s397_s0 + $0x10] sm:$0xff] }
   0x2   :  { %v265_v2 = vpack.c.bf16 %v24_v1, %v23_v0  ;;  %v19_v3 = vld [vmem:[%s397_s0] sm:$0xff]  ;;  %v25_v5 = vld [vmem:[%s398_s1 + $0x10] sm:$0xff]  ;;  %262 = vmatprep.mubr.msk.f32.mxu1 %vm26_vm0, %v21_v4 }
   0x3   :  { %259 = vmatprep.mubr.msk.f32.mxu0 %vm26_vm0, %v19_v3 }
   0x4   :  { %9 = vsyncpa [#allocation3], 0  ;;  %266 = vmatprep.subr.bf16.mxu0 %v265_v2  ;;  %269 = vmatprep.subr.bf16.mxu1 %v265_v2  ;;  %v20_v6 = vld [vmem:[%s397_s0 + $0x8] sm:$0xff]  ;;  %v22_v7 = vld [vmem:[%s397_s0 + $0x18] sm:$0xff]  ;;  %vm124_vm1 = vcmask 130048   ;;  %v307_v36 = vmov 0  }
   0x5   :  { %268 = vmatpush3.bf16.msra.mxu0 %v265_v2  ;;  %271 = vmatpush3.bf16.msra.mxu1 %v265_v2  ;;  %v170_v47 = vld [vmem:[%s399_s2] sm:$0xff]  ;;  %v171_v50 = vld [vmem:[%s399_s2 + $0x8] sm:$0xff]  ;;  %s308_s2 = smov [#allocation2]  }
   0x6   :  { %257 = vmatprep.subr.mxu0 %v25_v5  ;;  %270 = vmatprep.subr.mxu1 %v25_v5  ;;  %v173_v53 = vld [vmem:[%s400_s3] sm:$0xff]  ;;  %v174_v54 = vld [vmem:[%s400_s3 + $0x8] sm:$0xff]  ;;  %s231_s9 = sshll.u32 %s308_s2, 4  ;;  %s232_s9 = int_to_ptr.vmem [resolvable:$true] %s231_s9 }
   0x7   :  { %277 = vset.pattern.permute.xlu0 %v307_v36  ;;  %278 = vset.pattern.permute.xlu1 %v307_v36  ;;  %s283_s3 = scalar_lea.vmem %s232_s9, 512  ;;  %p288_p1 = scmp.lt.s32.totalorder %s232_s9, %s232_s9 }
   0x8   :  { %p284_p0 = scmp.ne.s32.totalorder %s232_s9, %s283_s3  ;;  %p289_p2 = scmp.lt.s32.totalorder %s283_s3, %s283_s3 }
   0x9   :  { %258 = vmatpush3.msra.mxu0 %v25_v5  ;;  %272 = vmatpush3.msra.mxu1 %v25_v5 }
   0xa   :  { %260 = vmatmul.mubr.msk.f32.vlgmr.msra.gmra.mrb[0].mxu0 %vm26_vm0, %v20_v6  ;;  %263 = vmatmul.mubr.msk.f32.vlgmr.msra.gmra.mrb[0].mxu1 %vm26_vm0, %v22_v7  ;;  %p290_p3 = por %p289_p2, %p288_p1 }
   0xc   :  { %p291_p4 = pnand %p290_p3, %p284_p0 }
  0xdd   :  { %v261_v8 = vpop.f32.mrb[0].mxu0  ;;  %v264_v9 = vpop.f32.mrb[0].mxu1 }
  0xde   :  { %v105_v10 = vpop.f32.mrb[1].mxu0  ;;  %v115_v11 = vpop.f32.mrb[1].mxu1  ;;  %v136_v14 = vsel %vm124_vm1, %v264_v9, 0.0  ;;  %v128_v15 = vsel %vm124_vm1, %v261_v8, 0.0 }
  0xdf   :  { %v133_v12 = vsel %vm124_vm1, %v115_v11, 0.0  ;;  %v125_v13 = vsel %vm124_vm1, %v105_v10, 0.0 }
  0xe0   :  { %134 = vadd.xlane.f32.xlu1 %v133_v12  ;;  %126 = vadd.xlane.f32.xlu0 %v125_v13 }
  0xe4   :  { %137 = vadd.xlane.f32.xlu1 %v136_v14  ;;  %129 = vadd.xlane.f32.xlu0 %v128_v15 }
 0x16d   :  { %v135_v16 = vpop.xlane.xlu1 %134  ;;  %v127_v17 = vpop.xlane.xlu0 %126 }
 0x16e   :  { %v139_v18 = vadd.f32 %v135_v16, %v127_v17 }
 0x170   :  { %v141_v19 = vmul.f32 0.03125, %v139_v18 }
 0x171   :  { %v138_v20 = vpop.xlane.xlu1 %137  ;;  %v130_v21 = vpop.xlane.xlu0 %129 }
 0x172   :  { %v143_v22 = vsub.f32 %v105_v10, %v141_v19  ;;  %v155_v23 = vsub.f32 %v115_v11, %v141_v19  ;;  %v140_v24 = vadd.f32 %v138_v20, %v130_v21 }
 0x174   :  { %v142_v25 = vmul.f32 0.03125, %v140_v24  ;;  %v145_v26 = vmul.f32 %v143_v22, %v143_v22  ;;  %v157_v30 = vmul.f32 %v155_v23, %v155_v23 }
 0x176   :  { %v144_v27 = vsub.f32 %v261_v8, %v142_v25  ;;  %v156_v28 = vsub.f32 %v264_v9, %v142_v25  ;;  %v147_v29 = vsel %vm124_vm1, %v145_v26, 0.0  ;;  %v159_v32 = vsel %vm124_vm1, %v157_v30, 0.0 }
 0x177   :  { %148 = vadd.xlane.f32.xlu0 %v147_v29 }
 0x178   :  { %v146_v31 = vmul.f32 %v144_v27, %v144_v27  ;;  %v158_v34 = vmul.f32 %v156_v28, %v156_v28 }
 0x17a   :  { %v150_v33 = vsel %vm124_vm1, %v146_v31, 0.0  ;;  %v162_v35 = vsel %vm124_vm1, %v158_v34, 0.0 }
 0x17b   :  { %160 = vadd.xlane.f32.xlu0 %v159_v32  ;;  %151 = vadd.xlane.f32.xlu1 %v150_v33 }
 0x17f   :  { %163 = vadd.xlane.f32.xlu1 %v162_v35 }
 0x204   :  { %v149_v37 = vpop.xlane.xlu0 %148 }
 0x208   :  { %v152_v38 = vpop.xlane.xlu1 %151  ;;  %v161_v39 = vpop.xlane.xlu0 %160 }
 0x209   :  { %v165_v40 = vadd.f32 %v161_v39, %v149_v37 }
 0x20b   :  { %v167_v41 = vmul.f32 0.03125, %v165_v40 }
 0x20c   :  { %v164_v42 = vpop.xlane.xlu1 %163 }
 0x20d   :  { %v175_v43 = vadd.f32 1e-05, %v167_v41  ;;  %v166_v44 = vadd.f32 %v164_v42, %v152_v38 }
 0x20f   :  { %279 = vrsqrt.f32 %v175_v43  ;;  %v168_v45 = vmul.f32 0.03125, %v166_v44 }
 0x211   :  { %v176_v46 = vadd.f32 1e-05, %v168_v45 }
 0x213   :  { %281 = vrsqrt.f32 %v176_v46 }
 0x219   :  { %v280_v48 = vpop.eup %279 }
 0x21a   :  { %v179_v49 = vmul.f32 %v280_v48, %v170_v47 }
 0x21c   :  { %183 = vperm.xlu0 %277, %v179_v49  }
 0x21d   :  { %v282_v51 = vpop.eup %281 }
 0x21e   :  { %v180_v52 = vmul.f32 %v282_v51, %v171_v50 }
 0x220   :  { %188 = vperm.xlu1 %278, %v180_v52  }
 0x224   :  { %195 = vperm.xlu1 %278, %v173_v53  }
 0x228   :  { %200 = vperm.xlu1 %278, %v174_v54  }
 0x29b   :  { %v184_v55 = vpop.permute.xlu0 %183 }
 0x29c   :  { %v191_v57 = vmul.f32 %v184_v55, %v143_v22  ;;  %v213_v58 = vmul.f32 %v184_v55, %v155_v23 }
 0x29f   :  { %v189_v56 = vpop.permute.xlu1 %188 }
 0x2a0   :  { %v192_v62 = vmul.f32 %v189_v56, %v144_v27  ;;  %v214_v63 = vmul.f32 %v189_v56, %v156_v28 }
 0x2a3   :  { %v196_v59 = vpop.permute.xlu1 %195 }
 0x2a4   :  { %v203_v60 = vadd.f32 %v196_v59, %v191_v57  ;;  %v215_v61 = vadd.f32 %v213_v58, %v196_v59 }
 0x2a6   :  { %vm205_vm2 = vcmp.ge.f32.partialorder %v203_v60, 0.0  ;;  %v207_v0 = vmul.f32 0.2, %v203_v60  ;;  %vm217_vm3 = vcmp.ge.f32.partialorder %v215_v61, 0.0  ;;  %v219_v1 = vmul.f32 0.2, %v215_v61 }
 0x2a7   :  { %v201_v2 = vpop.permute.xlu1 %200 }
 0x2a8   :  { %v209_v3 = vsel %vm205_vm2, %v203_v60, %v207_v0  ;;  %v221_v4 = vsel %vm217_vm3, %v215_v61, %v219_v1  ;;  %v204_v5 = vadd.f32 %v201_v2, %v192_v62  ;;  %v216_v6 = vadd.f32 %v214_v63, %v201_v2 }
 0x2a9   :  { %211 = vst.msk [vmem:[#allocation2] sm:$0xff] %vm124_vm1, %v209_v3  ;;  %224 = vst.msk [vmem:[#allocation2 + $0x10] sm:$0xff] %vm124_vm1, %v221_v4 }
 0x2aa   :  { %vm206_vm4 = vcmp.ge.f32.partialorder %v204_v5, 0.0  ;;  %v208_v7 = vmul.f32 0.2, %v204_v5  ;;  %vm218_vm5 = vcmp.ge.f32.partialorder %v216_v6, 0.0  ;;  %v220_v8 = vmul.f32 0.2, %v216_v6 }
 0x2ac   :  { %v210_v9 = vsel %vm206_vm4, %v204_v5, %v208_v7  ;;  %v222_v10 = vsel %vm218_vm5, %v216_v6, %v220_v8 }
 0x2ad   :  { %212 = vst.msk [vmem:[#allocation2 + $0x8] sm:$0xff] %vm124_vm1, %v210_v9  ;;  %225 = vst.msk [vmem:[#allocation2 + $0x18] sm:$0xff] %vm124_vm1, %v222_v10 }
 0x2ae   :  { %294 = shalt.err (!%p291_p4)
}
 0x2af   :  { %s295_s12 = scalar_lea.hbm %s401_s4, 512 }
 0x2b0   :  { %p296_p5 = scmp.ne.s32.totalorder %s401_s4, %s295_s12  ;;  %p299_p6 = scmp.lt.u32.totalorder %s295_s12, %s401_s4 }
 0x2b2   :  { %p301_p7 = pnand %p299_p6, %p296_p5 }
 0x2b4   :  { %304 = shalt.err (!%p301_p7)
}
 0x2b5   :  { %s309_s17 = smov 128   ;;  %s310_s18 = smov 8  }
 0x2b6   :  { %237 = dma.vmem_to_hbm [thread:$0]  %s232_s9, 512, %s401_s4, [#allocation3], %s309_s17, %s309_s17, %s310_s18  }
 0x2b7   :  { %305 = dma.done.wait [#allocation3], 512  }
 0x2b8   :  { %306 = vsyncadd [#allocation3], 4294966784 }
 0x2b9   :  { %241 = vsyncpa [#allocation3], 1 }

</bundles_post_ra>
